<compile_context>
chip_gen: v7x
topology: tpu7x:2x2x1
jax: 0.10.0
libtpu: 0.0.40
codegen_flags: <defaults>
</compile_context>

<pallas_src>
import jax
import jax.numpy as jnp
from jax.experimental import pallas as pl
from jax.experimental.pallas import tpu as pltpu


def _round_up(x, m):
    return ((x + m - 1) // m) * m


def _dice_partial_kernel(x_ref, t_ref, inter_ref, denom_ref, inter_acc, denom_acc):
    # Grid: (P parallel feature chunks, T reduction tiles per chunk).
    k = pl.program_id(1)

    @pl.when(k == 0)
    def _():
        inter_acc[...] = jnp.zeros_like(inter_acc)
        denom_acc[...] = jnp.zeros_like(denom_acc)

    # Native-dtype tiles on the wire; upcast to f32 on the VPU (hidden by DMA).
    x = x_ref[...].astype(jnp.float32)   # (rows, TILE_D)
    t = t_ref[...].astype(jnp.float32)

    rows, tile_d = x_ref.shape
    num_chunks = tile_d // 128

    # Lane-wide partial accumulation: only elementwise VPU adds per tile.
    ia = inter_acc[...]
    da = denom_acc[...]
    for c in range(num_chunks):
        sl = slice(c * 128, (c + 1) * 128)
        xs = x[:, sl]
        ts = t[:, sl]
        ia = ia + xs * ts          # intersection partials
        da = da + (xs + ts)        # fused denominator partials
    inter_acc[...] = ia
    denom_acc[...] = da

    # Single cross-lane reduce + (lane-sparse but rare) store in the finalize.
    @pl.when(k == pl.num_programs(1) - 1)
    def _():
        inter_ref[...] = jnp.sum(ia, axis=1, keepdims=True)[None]   # (1, rows, 1)
        denom_ref[...] = jnp.sum(da, axis=1, keepdims=True)[None]


def dice_loss(input_arr, target_arr, *, lane_tile=2048):
    """Computes DiceLoss(input, target) exactly as the PyTorch module does."""
    N = target_arr.shape[0]
    x = input_arr.reshape(N, -1)
    t = target_arr.reshape(N, -1)
    assert x.shape == t.shape, "input/target must flatten to the same (N, D)"
    D = x.shape[1]

    # Sublane filling: split each sample into R rows so small batches fill
    # all 8 sublanes of an f32 vreg.  For very large batches, skip it.
    R = 8 if N <= 128 else 1
    rows = N * R

    # Per-row feature length before lane padding.
    d2_min = -(-D // R)

    # Lane tile: multiple of 128, capped so the two double-buffered input
    # blocks stay within ~8 MiB (under v5e's 16 MiB default scoped VMEM and
    # comfortably under v7x's 32 MiB scoped / 64 MiB physical VMEM).
    itemsize = max(jnp.dtype(x.dtype).itemsize, jnp.dtype(t.dtype).itemsize)
    budget_bytes = 8 * 1024 * 1024
    max_tile = budget_bytes // (4 * rows * itemsize)          # 2 inputs x 2 bufs
    max_tile = max(128, (max_tile // 128) * 128)
    tile_d = min(lane_tile, _round_up(d2_min, 128), max_tile)

    total_tiles = -(-d2_min // tile_d)

    # Leading "parallel" axis so both v7x TensorCores stream HBM concurrently.
    P = 2 if total_tiles >= 2 else 1
    total_tiles = _round_up(total_tiles, P)
    T = total_tiles // P

    d2 = total_tiles * tile_d          # per-row length after zero padding
    d_pad = d2 * R

    def prep(a):
        if d_pad != D:
            a = jnp.pad(a, ((0, 0), (0, d_pad - D)))   # zeros are exact for sums
        return a.reshape(rows, d2)

    x2 = prep(x)
    t2 = prep(t)

    inter_p, denom_p = pl.pallas_call(
        _dice_partial_kernel,
        out_shape=(
            jax.ShapeDtypeStruct((P, rows, 1), jnp.float32),
            jax.ShapeDtypeStruct((P, rows, 1), jnp.float32),
        ),
        grid_spec=pltpu.PrefetchScalarGridSpec(
            num_scalar_prefetch=0,
            grid=(P, T),
            in_specs=[
                pl.BlockSpec((rows, tile_d), lambda p, k: (0, p * T + k)),
                pl.BlockSpec((rows, tile_d), lambda p, k: (0, p * T + k)),
            ],
            out_specs=[
                pl.BlockSpec((1, rows, 1), lambda p, k: (p, 0, 0)),
                pl.BlockSpec((1, rows, 1), lambda p, k: (p, 0, 0)),
            ],
            scratch_shapes=[
                pltpu.VMEM((rows, 128), jnp.float32),
                pltpu.VMEM((rows, 128), jnp.float32),
            ],
        ),
        compiler_params=pltpu.CompilerParams(
            dimension_semantics=("parallel", "arbitrary")),
    )(x2, t2)

    # Tiny combine on (P, rows) scalars: merge parallel chunks, then merge the
    # R sublane-fill rows per sample, then dice + (1 - mean).
    inter_rows = jnp.sum(inter_p, axis=0)[:, 0]        # (rows,)
    denom_rows = jnp.sum(denom_p, axis=0)[:, 0]
    inter = jnp.sum(inter_rows.reshape(N, R), axis=1)  # (N,)
    denom = jnp.sum(denom_rows.reshape(N, R), axis=1)

    smooth = jnp.float32(1.0)
    loss = 2.0 * (inter + smooth) / (denom + smooth)
    return 1.0 - jnp.mean(loss)


if __name__ == "__main__":
    key = jax.random.PRNGKey(0)
    k1, k2 = jax.random.split(key)

    # Small, forward-consistent shapes: predicted probabilities and a binary mask.
    N, C, H, W = 2, 4, 16, 16
    input_x = jax.nn.sigmoid(jax.random.normal(k1, (N, C, H, W), dtype=jnp.float32))
    target = (jax.random.uniform(k2, (N, C, H, W)) > 0.5).astype(jnp.float32)

    result = dice_loss(input_x, target)
    result = jax.block_until_ready(result)

    # Pure-JAX reference check (same math as the PyTorch module).
    xf = input_x.reshape(N, -1)
    tf = target.reshape(N, -1)
    ref = 1.0 - jnp.mean(
        2.0 * (jnp.sum(xf * tf, axis=1) + 1.0)
        / (jnp.sum(xf, axis=1) + jnp.sum(tf, axis=1) + 1.0)
    )
    assert jnp.allclose(result, ref, rtol=1e-5, atol=1e-5), (result, ref)

    print("KERNEL_OK")
</pallas_src>

<mosaic_0001>
module attributes {stable_mosaic.version = 11 : i64} {
  func.func @_dice_partial_kernel(%arg0: i32, %arg1: i32, %arg2: memref<16x128xf32, #tpu.memory_space<vmem>>, %arg3: memref<16x128xf32, #tpu.memory_space<vmem>>, %arg4: memref<1x16x1xf32, #tpu.memory_space<vmem>>, %arg5: memref<1x16x1xf32, #tpu.memory_space<vmem>>, %arg6: memref<16x128xf32, #tpu.memory_space<vmem>>, %arg7: memref<16x128xf32, #tpu.memory_space<vmem>>) attributes {dimension_semantics = [#tpu.dimension_semantics<parallel>, #tpu.dimension_semantics<arbitrary>], iteration_bounds = array<i64: 1, 1>, scalar_prefetch = 0 : i64, scratch_operands = 2 : i64, tpu.core_type = #tpu.core_type<tc>, window_params = [{transform_indices = @transform_0, window_bounds = array<i64: 16, 128>}, {transform_indices = @transform_1, window_bounds = array<i64: 16, 128>}, {transform_indices = @transform_2, window_bounds = array<i64: 1, 16, 1>}, {transform_indices = @transform_3, window_bounds = array<i64: 1, 16, 1>}]} {
    %c0_i32 = arith.constant 0 : i32
    %0 = arith.cmpi eq, %arg1, %c0_i32 : i32
    %1 = arith.extui %0 : i1 to i32
    %c0_i32_0 = arith.constant 0 : i32
    %2 = arith.cmpi ne, %1, %c0_i32_0 : i32
    scf.if %2 {
      %cst = arith.constant 0.000000e+00 : f32
      %16 = vector.broadcast %cst : f32 to vector<16x128xf32>
      %c0_14 = arith.constant 0 : index
      %c0_15 = arith.constant 0 : index
      %17 = vector.load %arg6[%c0_14, %c0_15] : memref<16x128xf32, #tpu.memory_space<vmem>>, vector<16x128xf32>
      tpu.vector_store %arg6[%c0_14, %c0_15], %16 {strides = array<i32>} : memref<16x128xf32, #tpu.memory_space<vmem>>, vector<16x128xf32>,
      %cst_16 = arith.constant 0.000000e+00 : f32
      %18 = vector.broadcast %cst_16 : f32 to vector<16x128xf32>
      %c0_17 = arith.constant 0 : index
      %c0_18 = arith.constant 0 : index
      %19 = vector.load %arg7[%c0_17, %c0_18] : memref<16x128xf32, #tpu.memory_space<vmem>>, vector<16x128xf32>
      tpu.vector_store %arg7[%c0_17, %c0_18], %18 {strides = array<i32>} : memref<16x128xf32, #tpu.memory_space<vmem>>, vector<16x128xf32>,
    } else {
    }
    %c0 = arith.constant 0 : index
    %c0_1 = arith.constant 0 : index
    %3 = vector.load %arg2[%c0, %c0_1] : memref<16x128xf32, #tpu.memory_space<vmem>>, vector<16x128xf32>
    %c0_2 = arith.constant 0 : index
    %c0_3 = arith.constant 0 : index
    %4 = vector.load %arg3[%c0_2, %c0_3] : memref<16x128xf32, #tpu.memory_space<vmem>>, vector<16x128xf32>
    %c0_4 = arith.constant 0 : index
    %c0_5 = arith.constant 0 : index
    %5 = vector.load %arg6[%c0_4, %c0_5] : memref<16x128xf32, #tpu.memory_space<vmem>>, vector<16x128xf32>
    %c0_6 = arith.constant 0 : index
    %c0_7 = arith.constant 0 : index
    %6 = vector.load %arg7[%c0_6, %c0_7] : memref<16x128xf32, #tpu.memory_space<vmem>>, vector<16x128xf32>
    %7 = arith.mulf %3, %4 : vector<16x128xf32>
    %8 = arith.addf %5, %7 : vector<16x128xf32>
    %9 = arith.addf %3, %4 : vector<16x128xf32>
    %10 = arith.addf %6, %9 : vector<16x128xf32>
    %c0_8 = arith.constant 0 : index
    %c0_9 = arith.constant 0 : index
    %11 = vector.load %arg6[%c0_8, %c0_9] : memref<16x128xf32, #tpu.memory_space<vmem>>, vector<16x128xf32>
    tpu.vector_store %arg6[%c0_8, %c0_9], %8 {strides = array<i32>} : memref<16x128xf32, #tpu.memory_space<vmem>>, vector<16x128xf32>,
    %c0_10 = arith.constant 0 : index
    %c0_11 = arith.constant 0 : index
    %12 = vector.load %arg7[%c0_10, %c0_11] : memref<16x128xf32, #tpu.memory_space<vmem>>, vector<16x128xf32>
    tpu.vector_store %arg7[%c0_10, %c0_11], %10 {strides = array<i32>} : memref<16x128xf32, #tpu.memory_space<vmem>>, vector<16x128xf32>,
    %c0_i32_12 = arith.constant 0 : i32
    %13 = arith.cmpi eq, %arg1, %c0_i32_12 : i32
    %14 = arith.extui %13 : i1 to i32
    %c0_i32_13 = arith.constant 0 : i32
    %15 = arith.cmpi ne, %14, %c0_i32_13 : i32
    scf.if %15 {
      %cst = arith.constant dense<0.000000e+00> : vector<16xf32>
      %16 = vector.multi_reduction <add>, %8, %cst [1] : vector<16x128xf32> to vector<16xf32>
      %17 = vector.shape_cast %16 : vector<16xf32> to vector<16x1xf32>
      %18 = vector.shape_cast %17 : vector<16x1xf32> to vector<1x16x1xf32>
      %c0_14 = arith.constant 0 : index
      %c0_15 = arith.constant 0 : index
      %c0_16 = arith.constant 0 : index
      %19 = vector.load %arg4[%c0_14, %c0_15, %c0_16] : memref<1x16x1xf32, #tpu.memory_space<vmem>>, vector<1x16x1xf32>
      tpu.vector_store %arg4[%c0_14, %c0_15, %c0_16], %18 {strides = array<i32>} : memref<1x16x1xf32, #tpu.memory_space<vmem>>, vector<1x16x1xf32>,
      %cst_17 = arith.constant dense<0.000000e+00> : vector<16xf32>
      %20 = vector.multi_reduction <add>, %10, %cst_17 [1] : vector<16x128xf32> to vector<16xf32>
      %21 = vector.shape_cast %20 : vector<16xf32> to vector<16x1xf32>
      %22 = vector.shape_cast %21 : vector<16x1xf32> to vector<1x16x1xf32>
      %c0_18 = arith.constant 0 : index
      %c0_19 = arith.constant 0 : index
      %c0_20 = arith.constant 0 : index
      %23 = vector.load %arg5[%c0_18, %c0_19, %c0_20] : memref<1x16x1xf32, #tpu.memory_space<vmem>>, vector<1x16x1xf32>
      tpu.vector_store %arg5[%c0_18, %c0_19, %c0_20], %22 {strides = array<i32>} : memref<1x16x1xf32, #tpu.memory_space<vmem>>, vector<1x16x1xf32>,
    } else {
    }
    return
  }
  func.func @transform_0(%arg0: i32, %arg1: i32) -> (i32, i32) {
    %c1_i32 = arith.constant 1 : i32
    %0 = arith.muli %arg0, %c1_i32 : i32
    %1 = arith.addi %0, %arg1 : i32
    %c0_i32 = arith.constant 0 : i32
    %c0_i32_0 = arith.constant 0 : i32
    return %c0_i32, %1 : i32, i32
  }
  func.func @transform_1(%arg0: i32, %arg1: i32) -> (i32, i32) {
    %c1_i32 = arith.constant 1 : i32
    %0 = arith.muli %arg0, %c1_i32 : i32
    %1 = arith.addi %0, %arg1 : i32
    %c0_i32 = arith.constant 0 : i32
    %c0_i32_0 = arith.constant 0 : i32
    return %c0_i32, %1 : i32, i32
  }
  func.func @transform_2(%arg0: i32, %arg1: i32) -> (i32, i32, i32) {
    %c0_i32 = arith.constant 0 : i32
    %c0_i32_0 = arith.constant 0 : i32
    %c0_i32_1 = arith.constant 0 : i32
    return %arg0, %c0_i32, %c0_i32_0 : i32, i32, i32
  }
  func.func @transform_3(%arg0: i32, %arg1: i32) -> (i32, i32, i32) {
    %c0_i32 = arith.constant 0 : i32
    %c0_i32_0 = arith.constant 0 : i32
    %c0_i32_1 = arith.constant 0 : i32
    return %arg0, %c0_i32, %c0_i32_0 : i32, i32, i32
  }
}

</mosaic_0001>

<bundles_post_ra>
// kernel: tpu_custom_call.1
= control target key start
LH: loop header
LB: loop body
LE: loop exit
PB: predicated region body
PF: predicated region fallthrough
CT: control target
= control target key end

     0   :  { %9 = vsyncpa [#allocation5], 0  ;;  %s215_s0 = inlined_call_operand.hbm [shape: f32[16,128], index: 0, kind: input, shape index: {}]   ;;  %s216_s1 = inlined_call_operand.hbm [shape: f32[16,128], index: 1, kind: input, shape index: {}]   ;;  %s217_s2 = inlined_call_operand.vmem [shape: f32[1,16,1], index: 2, kind: output, shape index: {0}]   ;;  %s218_s3 = inlined_call_operand.vmem [shape: f32[1,16,1], index: 3, kind: output, shape index: {1}]  }
   0x1   :  { %10 = vsyncpa [#allocation7], 0  ;;  %s155_s12 = smov [#allocation4]   ;;  %s107_s16 = scalar_lea.hbm %s215_s0, 256 }
   0x2   :  { %s19_s13 = sshll.u32 %s155_s12, 4  ;;  %p108_p0 = scmp.ne.s32.totalorder %s215_s0, %s107_s16  ;;  %s20_s13 = int_to_ptr.vmem [resolvable:$true] %s19_s13 }
   0x3   :  { %p111_p1 = scmp.lt.u32.totalorder %s107_s16, %s215_s0 }
   0x5   :  { %p113_p2 = pnand %p111_p1, %p108_p0 }
   0x7   :  { %116 = shalt.err (!%p113_p2)
}
   0x8   :  { %s117_s21 = scalar_lea.vmem %s20_s13, 256  ;;  %p122_p4 = scmp.lt.s32.totalorder %s20_s13, %s20_s13 }
   0x9   :  { %p118_p3 = scmp.ne.s32.totalorder %s20_s13, %s117_s21  ;;  %p123_p5 = scmp.lt.s32.totalorder %s117_s21, %s117_s21 }
   0xb   :  { %p124_p6 = por %p123_p5, %p122_p4 }
   0xd   :  { %p125_p7 = pnand %p124_p6, %p118_p3 }
   0xf   :  { %128 = shalt.err (!%p125_p7)
}
  0x10   :  { %s156_s22 = smov 128   ;;  %s157_s23 = smov 8  }
  0x11   :  { %25 = dma.hbm_to_vmem [thread:$0]  %s215_s0, 256, %s20_s13, [#allocation5], %s156_s22, %s156_s22, %s157_s23  }
  0x12   :  { %s158_s26 = smov [#allocation6]   ;;  %s129_s30 = scalar_lea.hbm %s216_s1, 256 }
  0x13   :  { %s34_s27 = sshll.u32 %s158_s26, 4  ;;  %p130_p8 = scmp.ne.s32.totalorder %s216_s1, %s129_s30  ;;  %s35_s27 = int_to_ptr.vmem [resolvable:$true] %s34_s27 }
  0x14   :  { %p133_p9 = scmp.lt.u32.totalorder %s129_s30, %s216_s1 }
  0x16   :  { %p135_p10 = pnand %p133_p9, %p130_p8 }
  0x18   :  { %138 = shalt.err (!%p135_p10)
}
  0x19   :  { %s139_s8 = scalar_lea.vmem %s35_s27, 256  ;;  %p144_p12 = scmp.lt.s32.totalorder %s35_s27, %s35_s27 }
  0x1a   :  { %p140_p11 = scmp.ne.s32.totalorder %s35_s27, %s139_s8  ;;  %p145_p13 = scmp.lt.s32.totalorder %s139_s8, %s139_s8 }
  0x1c   :  { %p146_p0 = por %p145_p13, %p144_p12 }
  0x1e   :  { %p147_p1 = pnand %p146_p0, %p140_p11 }
  0x20   :  { %150 = shalt.err (!%p147_p1)
}
  0x21   :  { %40 = dma.hbm_to_vmem [thread:$0]  %s216_s1, 256, %s35_s27, [#allocation7], %s156_s22, %s156_s22, %s157_s23  }
  0x22   :  { %151 = dma.done.wait [#allocation5], 256  }
  0x23   :  { %152 = vsyncadd [#allocation5], 4294967040 }
  0x24   :  { %153 = dma.done.wait [#allocation7], 256  }
  0x25   :  { %154 = vsyncadd [#allocation7], 4294967040  ;;  %v57_v0 = vld [vmem:[#allocation4] sm:$0xff]  ;;  %v59_v1 = vld [vmem:[#allocation6] sm:$0xff]  ;;  %vm84_vm0 = vcmask 7168  }
  0x26   :  { %v58_v2 = vld [vmem:[#allocation4 + $0x8] sm:$0xff]  ;;  %v69_v3 = vadd.f32 %v59_v1, %v57_v0  ;;  %v65_v4 = vmul.f32 %v59_v1, %v57_v0  ;;  %v60_v5 = vld [vmem:[#allocation6 + $0x8] sm:$0xff] }
  0x27   :  { %v70_v6 = vadd.f32 %v60_v5, %v58_v2  ;;  %v66_v7 = vmul.f32 %v60_v5, %v58_v2 }
  0x28   :  { %87 = vadd.xlane.f32.xlu1 %v69_v3  ;;  %80 = vadd.xlane.f32.xlu0 %v65_v4 }
  0x2c   :  { %89 = vadd.xlane.f32.xlu1 %v70_v6  ;;  %82 = vadd.xlane.f32.xlu0 %v66_v7 }
  0xb5   :  { %v88_v8 = vpop.xlane.xlu1 %87  ;;  %v81_v9 = vpop.xlane.xlu0 %80 }
  0xb6   :  { %91 = vst.msk [vmem:[%s218_s3] sm:$0xff] %vm84_vm0, %v88_v8  ;;  %85 = vst.msk [vmem:[%s217_s2] sm:$0xff] %vm84_vm0, %v81_v9 }
  0xb9   :  { %v90_v10 = vpop.xlane.xlu1 %89  ;;  %v83_v11 = vpop.xlane.xlu0 %82 }
  0xba   :  { %92 = vst.msk [vmem:[%s218_s3 + $0x8] sm:$0xff] %vm84_vm0, %v90_v10  ;;  %86 = vst.msk [vmem:[%s217_s2 + $0x8] sm:$0xff] %vm84_vm0, %v83_v11 }
  0xbb   :  { %101 = vsyncpa [#allocation5], 1 }
  0xbc   :  { %102 = vsyncpa [#allocation7], 1 }

</bundles_post_ra>
